<compile_context>
chip_gen: v5e
topology: v5e:2x2
jax: 0.10.0
libtpu: 0.0.40
codegen_flags: <defaults>
</compile_context>

<pallas_src>
import jax
import jax.numpy as jnp
from jax.experimental import pallas as pl
from jax.experimental.pallas import tpu as pltpu

# ---- model hyper-parameters (from MyModel.__init__ / args) ----
IMG_DIM = 2048          # resnet pooled feature size (non-'enhance' branch)
HIDDEN = 768            # bert hidden size
IMG_TOKEN_NUM = 2       # args.img_token_num (small)
CLASS_NUM = 8           # class_num (small)
BATCH = 4               # small batch

LANE = 128              # TPU lane width
SUBLANE = 8             # f32 sublane tile
STACK_DIM = IMG_DIM + HIDDEN          # 2816 = 22 * 128, lane-aligned K
CLASS_PAD = LANE                      # class dim padded to one full lane tile


def _cls_kernel(x_ref, w_ref, b_ref, o_ref):
    """Single-invocation kernel (all operands VMEM-resident):
         o = x @ W_stack + b_fused
       x:[Bp,2816]  W:[2816,128]  b:[1,128]  o:[Bp,128]  (all f32)."""
    o_ref[...] = (jnp.dot(x_ref[...], w_ref[...],
                          preferred_element_type=jnp.float32)
                  + b_ref[...])


def fold_weights(w_conv, b_conv, w_cls, b_cls):
    """One-time algebraic fusion + stacking of converter + classifier (valid
    because there is no nonlinearity between them).  Runs once at model-load
    time and is cached; NOT per-forward work."""
    t_hidden = IMG_TOKEN_NUM * HIDDEN
    w_cls_img = w_cls[:t_hidden, :]                  # [T*768, C]
    w_cls_txt = w_cls[t_hidden:, :]                  # [768,   C]
    w_fused = w_conv @ w_cls_img                     # [2048,  C]
    b_fused = b_conv @ w_cls_img + b_cls             # [C]
    # stack so the kernel does one contraction over K = 2048 + 768 = 2816
    w_stack = jnp.concatenate([w_fused, w_cls_txt], axis=0)       # [2816, C]
    # zero-pad the class dim to a full 128-lane tile (lane-dense output stores)
    w_stack = jnp.pad(w_stack, ((0, 0), (0, CLASS_PAD - CLASS_NUM)))
    b_pad = jnp.pad(b_fused, (0, CLASS_PAD - CLASS_NUM)).reshape(1, CLASS_PAD)
    return w_stack, b_pad


def mymodel_naive_forward(img_features, text_emb, labels, w_stack, b_pad):
    """img_features: [B, IMG_DIM] f32
       text_emb    : [B, HIDDEN]  f32
       labels      : [B] int32
       w_stack     : [STACK_DIM, CLASS_PAD]  (pre-folded, stacked, lane-padded)
       b_pad       : [1, CLASS_PAD]
    returns (cls_output [B, CLASS_NUM] f32, one_hot [B, CLASS_NUM] f32)"""
    B = img_features.shape[0]

    # single stacked activation [B, 2816]; pad batch to a multiple of 8 sublanes
    x = jnp.concatenate([img_features, text_emb], axis=1)
    pad_rows = (-B) % SUBLANE
    if pad_rows:
        x = jnp.pad(x, ((0, pad_rows), (0, 0)))
    Bp = x.shape[0]

    vmem = pl.BlockSpec(memory_space=pltpu.MemorySpace.VMEM)

    flops = 2 * Bp * STACK_DIM * CLASS_PAD
    bytes_accessed = 4 * (Bp * STACK_DIM                      # activations
                          + STACK_DIM * CLASS_PAD             # stacked weight
                          + CLASS_PAD                         # bias
                          + Bp * CLASS_PAD)                   # output

    cls_pad = pl.pallas_call(
        _cls_kernel,
        out_shape=jax.ShapeDtypeStruct((Bp, CLASS_PAD), jnp.float32),
        in_specs=[vmem, vmem, vmem],
        out_specs=vmem,
        compiler_params=pltpu.CompilerParams(vmem_limit_bytes=32 << 20),
        cost_estimate=pl.CostEstimate(flops=flops, transcendentals=0,
                                      bytes_accessed=bytes_accessed),
    )(x, w_stack, b_pad)

    cls_out = cls_pad[:B, :CLASS_NUM]

    # one-hot (scatter_(1, labels, 1)) handled by XLA outside the kernel;
    # it overlaps with the custom call for free.
    one_hot = jax.nn.one_hot(labels, CLASS_NUM, dtype=jnp.float32)
    return cls_out, one_hot


if __name__ == "__main__":
    key = jax.random.PRNGKey(0)
    k_img, k_txt, k_wc, k_bc, k_wcls, k_bcls, k_lab = jax.random.split(key, 7)

    t_hidden = IMG_TOKEN_NUM * HIDDEN
    concat_dim = (IMG_TOKEN_NUM + 1) * HIDDEN

    # deterministic synthetic parameters (shapes from MyModel.__init__),
    # stored transposed vs. PyTorch: [in_features, out_features]
    w_conv = jax.random.normal(k_wc, (IMG_DIM, t_hidden), jnp.float32) * 0.02
    b_conv = jax.random.normal(k_bc, (t_hidden,), jnp.float32) * 0.02
    w_cls = jax.random.normal(k_wcls, (concat_dim, CLASS_NUM), jnp.float32) * 0.02
    b_cls = jax.random.normal(k_bcls, (CLASS_NUM,), jnp.float32) * 0.02

    # deterministic synthetic inputs (b_img stacked, b_text stacked, b_labels)
    img_features = jax.random.normal(k_img, (BATCH, IMG_DIM), jnp.float32)
    text_emb = jax.random.normal(k_txt, (BATCH, HIDDEN), jnp.float32)
    labels = jax.random.randint(k_lab, (BATCH,), 0, CLASS_NUM, jnp.int32)

    # one-time weight prep (model-load time in a real pipeline)
    w_stack, b_pad = fold_weights(w_conv, b_conv, w_cls, b_cls)
    w_stack = jax.block_until_ready(w_stack)

    cls_out, one_hot = mymodel_naive_forward(
        img_features, text_emb, labels, w_stack, b_pad)
    cls_out = jax.block_until_ready(cls_out)
    one_hot = jax.block_until_ready(one_hot)

    # pure-JAX reference check against the ORIGINAL (unfused) computation.
    # The fold reorders f32 accumulation, so tolerance is slightly loosened.
    img_out_ref = img_features @ w_conv + b_conv
    inputs_embeds = jnp.concatenate([img_out_ref, text_emb], axis=1)
    cls_ref = inputs_embeds @ w_cls + b_cls
    one_hot_ref = jax.nn.one_hot(labels, CLASS_NUM, dtype=jnp.float32)

    assert cls_out.shape == (BATCH, CLASS_NUM)
    assert jnp.allclose(cls_out, cls_ref, atol=1e-3, rtol=1e-3)
    assert jnp.array_equal(one_hot, one_hot_ref)

    print("KERNEL_OK")
</pallas_src>

<mosaic_0001>
module attributes {stable_mosaic.version = 11 : i64} {
  func.func @_cls_kernel(%arg0: memref<8x2816xf32, #tpu.memory_space<vmem>>, %arg1: memref<2816x128xf32, #tpu.memory_space<vmem>>, %arg2: memref<1x128xf32, #tpu.memory_space<vmem>>, %arg3: memref<8x128xf32, #tpu.memory_space<vmem>>) attributes {dimension_semantics = [], scalar_prefetch = 0 : i64, scratch_operands = 0 : i64, tpu.core_type = #tpu.core_type<tc>} {
    %c0 = arith.constant 0 : index
    %c0_0 = arith.constant 0 : index
    %0 = vector.load %arg0[%c0, %c0_0] : memref<8x2816xf32, #tpu.memory_space<vmem>>, vector<8x2816xf32>
    %c0_1 = arith.constant 0 : index
    %c0_2 = arith.constant 0 : index
    %1 = vector.load %arg1[%c0_1, %c0_2] : memref<2816x128xf32, #tpu.memory_space<vmem>>, vector<2816x128xf32>
    %cst = arith.constant dense<0.000000e+00> : vector<8x128xf32>
    %2 = tpu.matmul %0, %1, %cst {dimension_numbers = #tpu.dot_dimension_numbers<[1], [0], [0], [1], [0, 0, 1, 1], [], []>} : vector<8x2816xf32>, vector<2816x128xf32>, vector<8x128xf32> -> vector<8x128xf32>
    %c0_3 = arith.constant 0 : index
    %c0_4 = arith.constant 0 : index
    %3 = vector.load %arg2[%c0_3, %c0_4] : memref<1x128xf32, #tpu.memory_space<vmem>>, vector<1x128xf32>
    %4 = vector.broadcast %3 : vector<1x128xf32> to vector<8x128xf32>
    %5 = arith.addf %2, %4 : vector<8x128xf32>
    %c0_5 = arith.constant 0 : index
    %c0_6 = arith.constant 0 : index
    %6 = vector.load %arg3[%c0_5, %c0_6] : memref<8x128xf32, #tpu.memory_space<vmem>>, vector<8x128xf32>
    tpu.vector_store %arg3[%c0_5, %c0_6], %5 {strides = array<i32>} : memref<8x128xf32, #tpu.memory_space<vmem>>, vector<8x128xf32>,
    return
  }
}

</mosaic_0001>

<bundles_post_ra>
// kernel: tpu_custom_call.1
= control target key start
LH: loop header
LB: loop body
LE: loop exit
PB: predicated region body
PF: predicated region fallthrough
CT: control target
= control target key end

     0   :  { %8 = vsyncpa [#allocation3], 0  ;;  %s1042_s0 = inlined_call_operand.hbm [shape: f32[8,2816], index: 0, kind: input, shape index: {}]   ;;  %s1043_s1 = inlined_call_operand.hbm [shape: f32[2816,128], index: 1, kind: input, shape index: {}]   ;;  %s1044_s2 = inlined_call_operand.hbm [shape: f32[1,128], index: 2, kind: input, shape index: {}]   ;;  %s1045_s3 = inlined_call_operand.hbm [shape: f32[8,128], index: 3, kind: output, shape index: {}]  }
   0x1   :  { %9 = vsyncpa [#allocation6], 0  ;;  %s26_s14 = sshll.u32 %s1043_s1, 4  ;;  %s27_s14 = int_to_ptr.hbm [resolvable:$true] %s26_s14 }
   0x2   :  { %10 = vsyncpa [#allocation4], 0  ;;  %s1004_s15 = smov [#allocation5]   ;;  %s16_s19 = sshll.u32 %s1042_s0, 4  ;;  %s17_s19 = int_to_ptr.hbm [resolvable:$true] %s16_s19 }
   0x3   :  { %s28_s16 = sshll.u32 %s1004_s15, 4  ;;  %s1005_s20 = smov 128   ;;  %s29_s16 = int_to_ptr.vmem [resolvable:$true] %s28_s16 }
   0x4   :  { %s1006_s21 = smov 8   ;;  %s1007_s22 = smov [#allocation2]  }
   0x5   :  { %34 = dma.hbm_to_vmem [thread:$0]  %s27_s14, 45056, %s29_s16, [#allocation6], %s1005_s20, %s1005_s20, %s1006_s21  }
   0x6   :  { %s18_s23 = sshll.u32 %s1007_s22, 4  ;;  %s40_s26 = sshll.u32 %s1044_s2, 4  ;;  %s19_s23 = int_to_ptr.vmem [resolvable:$true] %s18_s23  ;;  %s41_s26 = int_to_ptr.hbm [resolvable:$true] %s40_s26 }
   0x7   :  { %21 = dma.hbm_to_vmem [thread:$0]  %s17_s19, 2816, %s19_s23, [#allocation3]  }
   0x8   :  { %s1008_s1 = smov [#allocation7]  }
   0x9   :  { %s42_s27 = sshll.u32 %s1008_s1, 4  ;;  %s43_s27 = int_to_ptr.vmem [resolvable:$true] %s42_s27 }
   0xa   :  { %45 = dma.hbm_to_vmem [thread:$0]  %s41_s26, 16, %s43_s27, [#allocation6]  }
   0xb   :  { %998 = dma.done.wait [#allocation3], 2816  }
   0xc   :  { %999 = vsyncadd [#allocation3], 4294964480 }
   0xd   :  { %1000 = dma.done.wait [#allocation6], 45072  }
   0xe   :  { %1001 = vsyncadd [#allocation6], 4294922224  ;;  %v95_v0 = vld [vmem:[#allocation5 + $0x78] sm:$0xff]  ;;  %v94_v2 = vld [vmem:[#allocation5 + $0x70] sm:$0xff]  ;;  %s1009_s0 = smov [#allocation8]   ;;  %s884_s30 = sshll.u32 %s1045_s3, 4  ;;  %s885_s30 = int_to_ptr.hbm [resolvable:$true] %s884_s30 }
   0xf   :  { %v127_v1 = vld [vmem:[#allocation5 + $0x178] sm:$0xff]  ;;  %436 = vmatpush.msra.mxu0 %v95_v0  ;;  %v126_v4 = vld [vmem:[#allocation5 + $0x170] sm:$0xff]  ;;  %v93_v6 = vld [vmem:[#allocation5 + $0x68] sm:$0xff]  ;;  %s882_s2 = sshll.u32 %s1009_s0, 4  ;;  %s883_s2 = int_to_ptr.vmem [resolvable:$true] %s882_s2 }
  0x10   :  { %476 = vmatpush.msra.mxu2 %v127_v1  ;;  %v111_v3 = vld [vmem:[#allocation5 + $0xf8] sm:$0xff]  ;;  %v110_v7 = vld [vmem:[#allocation5 + $0xf0] sm:$0xff]  ;;  %v125_v8 = vld [vmem:[#allocation5 + $0x168] sm:$0xff] }
  0x11   :  { %v143_v5 = vld [vmem:[#allocation5 + $0x1f8] sm:$0xff]  ;;  %456 = vmatpush.msra.mxu1 %v111_v3  ;;  %437 = vmatpush.msra.mxu0 %v94_v2  ;;  %v142_v9 = vld [vmem:[#allocation5 + $0x1f0] sm:$0xff]  ;;  %v109_v10 = vld [vmem:[#allocation5 + $0xe8] sm:$0xff] }
  0x12   :  { %496 = vmatpush.msra.mxu3 %v143_v5  ;;  %477 = vmatpush.msra.mxu2 %v126_v4  ;;  %v92_v11 = vld [vmem:[#allocation5 + $0x60] sm:$0xff]  ;;  %v141_v13 = vld [vmem:[#allocation5 + $0x1e8] sm:$0xff]  ;;  %v91_v16 = vld [vmem:[#allocation5 + $0x58] sm:$0xff] }
  0x13   :  { %457 = vmatpush.msra.mxu1 %v110_v7  ;;  %v124_v12 = vld [vmem:[#allocation5 + $0x160] sm:$0xff]  ;;  %438 = vmatpush.msra.mxu0 %v93_v6  ;;  %v123_v17 = vld [vmem:[#allocation5 + $0x158] sm:$0xff]  ;;  %v90_v20 = vld [vmem:[#allocation5 + $0x50] sm:$0xff] }
  0x14   :  { %497 = vmatpush.msra.mxu3 %v142_v9  ;;  %478 = vmatpush.msra.mxu2 %v125_v8  ;;  %v108_v14 = vld [vmem:[#allocation5 + $0xe0] sm:$0xff]  ;;  %v107_v18 = vld [vmem:[#allocation5 + $0xd8] sm:$0xff]  ;;  %v122_v21 = vld [vmem:[#allocation5 + $0x150] sm:$0xff] }
  0x15   :  { %v140_v15 = vld [vmem:[#allocation5 + $0x1e0] sm:$0xff]  ;;  %458 = vmatpush.msra.mxu1 %v109_v10  ;;  %439 = vmatpush.msra.mxu0 %v92_v11  ;;  %v139_v19 = vld [vmem:[#allocation5 + $0x1d8] sm:$0xff]  ;;  %v106_v22 = vld [vmem:[#allocation5 + $0xd0] sm:$0xff] }
  0x16   :  { %498 = vmatpush.msra.mxu3 %v141_v13  ;;  %479 = vmatpush.msra.mxu2 %v124_v12  ;;  %v138_v23 = vld [vmem:[#allocation5 + $0x1d0] sm:$0xff]  ;;  %v89_v24 = vld [vmem:[#allocation5 + $0x48] sm:$0xff]  ;;  %v88_v28 = vld [vmem:[#allocation5 + $0x40] sm:$0xff] }
  0x17   :  { %459 = vmatpush.msra.mxu1 %v108_v14  ;;  %440 = vmatpush.msra.mxu0 %v91_v16  ;;  %v121_v25 = vld [vmem:[#allocation5 + $0x148] sm:$0xff]  ;;  %v120_v29 = vld [vmem:[#allocation5 + $0x140] sm:$0xff]  ;;  %v87_v32 = vld [vmem:[#allocation5 + $0x38] sm:$0xff] }
  0x18   :  { %499 = vmatpush.msra.mxu3 %v140_v15  ;;  %480 = vmatpush.msra.mxu2 %v123_v17  ;;  %v105_v26 = vld [vmem:[#allocation5 + $0xc8] sm:$0xff]  ;;  %v104_v30 = vld [vmem:[#allocation5 + $0xc0] sm:$0xff]  ;;  %v119_v33 = vld [vmem:[#allocation5 + $0x138] sm:$0xff] }
  0x19   :  { %460 = vmatpush.msra.mxu1 %v107_v18  ;;  %441 = vmatpush.msra.mxu0 %v90_v20  ;;  %v137_v27 = vld [vmem:[#allocation5 + $0x1c8] sm:$0xff]  ;;  %v136_v31 = vld [vmem:[#allocation5 + $0x1c0] sm:$0xff]  ;;  %v103_v34 = vld [vmem:[#allocation5 + $0xb8] sm:$0xff] }
  0x1a   :  { %500 = vmatpush.msra.mxu3 %v139_v19  ;;  %481 = vmatpush.msra.mxu2 %v122_v21  ;;  %v135_v35 = vld [vmem:[#allocation5 + $0x1b8] sm:$0xff]  ;;  %v86_v36 = vld [vmem:[#allocation5 + $0x30] sm:$0xff]  ;;  %v85_v40 = vld [vmem:[#allocation5 + $0x28] sm:$0xff] }
  0x1b   :  { %461 = vmatpush.msra.mxu1 %v106_v22  ;;  %442 = vmatpush.msra.mxu0 %v89_v24  ;;  %v118_v37 = vld [vmem:[#allocation5 + $0x130] sm:$0xff]  ;;  %v117_v41 = vld [vmem:[#allocation5 + $0x128] sm:$0xff]  ;;  %v84_v44 = vld [vmem:[#allocation5 + $0x20] sm:$0xff] }
  0x1c   :  { %501 = vmatpush.msra.mxu3 %v138_v23  ;;  %482 = vmatpush.msra.mxu2 %v121_v25  ;;  %v102_v38 = vld [vmem:[#allocation5 + $0xb0] sm:$0xff]  ;;  %v101_v42 = vld [vmem:[#allocation5 + $0xa8] sm:$0xff]  ;;  %v116_v45 = vld [vmem:[#allocation5 + $0x120] sm:$0xff] }
  0x1d   :  { %462 = vmatpush.msra.mxu1 %v105_v26  ;;  %443 = vmatpush.msra.mxu0 %v88_v28  ;;  %v134_v39 = vld [vmem:[#allocation5 + $0x1b0] sm:$0xff]  ;;  %v133_v43 = vld [vmem:[#allocation5 + $0x1a8] sm:$0xff]  ;;  %v100_v46 = vld [vmem:[#allocation5 + $0xa0] sm:$0xff] }
  0x1e   :  { %502 = vmatpush.msra.mxu3 %v137_v27  ;;  %483 = vmatpush.msra.mxu2 %v120_v29  ;;  %v132_v47 = vld [vmem:[#allocation5 + $0x1a0] sm:$0xff]  ;;  %v83_v48 = vld [vmem:[#allocation5 + $0x18] sm:$0xff]  ;;  %v82_v52 = vld [vmem:[#allocation5 + $0x10] sm:$0xff] }
  0x1f   :  { %463 = vmatpush.msra.mxu1 %v104_v30  ;;  %444 = vmatpush.msra.mxu0 %v87_v32  ;;  %v115_v49 = vld [vmem:[#allocation5 + $0x118] sm:$0xff]  ;;  %v114_v53 = vld [vmem:[#allocation5 + $0x110] sm:$0xff]  ;;  %v81_v56 = vld [vmem:[#allocation5 + $0x8] sm:$0xff] }
  0x20   :  { %503 = vmatpush.msra.mxu3 %v136_v31  ;;  %484 = vmatpush.msra.mxu2 %v119_v33  ;;  %v99_v50 = vld [vmem:[#allocation5 + $0x98] sm:$0xff]  ;;  %v98_v54 = vld [vmem:[#allocation5 + $0x90] sm:$0xff]  ;;  %v113_v57 = vld [vmem:[#allocation5 + $0x108] sm:$0xff] }
  0x21   :  { %464 = vmatpush.msra.mxu1 %v103_v34  ;;  %445 = vmatpush.msra.mxu0 %v86_v36  ;;  %v131_v51 = vld [vmem:[#allocation5 + $0x198] sm:$0xff]  ;;  %v130_v55 = vld [vmem:[#allocation5 + $0x190] sm:$0xff]  ;;  %v97_v58 = vld [vmem:[#allocation5 + $0x88] sm:$0xff] }
  0x22   :  { %504 = vmatpush.msra.mxu3 %v135_v35  ;;  %485 = vmatpush.msra.mxu2 %v118_v37  ;;  %v129_v59 = vld [vmem:[#allocation5 + $0x188] sm:$0xff]  ;;  %v80_v60 = vld [vmem:[#allocation5] sm:$0xff]  ;;  %v159_v62 = vld [vmem:[#allocation5 + $0x278] sm:$0xff] }
  0x23   :  { %465 = vmatpush.msra.mxu1 %v102_v38  ;;  %446 = vmatpush.msra.mxu0 %v85_v40  ;;  %v112_v61 = vld [vmem:[#allocation5 + $0x100] sm:$0xff]  ;;  %v191_v63 = vld [vmem:[#allocation5 + $0x378] sm:$0xff]  ;;  %v158_v2 = vld [vmem:[#allocation5 + $0x270] sm:$0xff] }
  0x24   :  { %505 = vmatpush.msra.mxu3 %v134_v39  ;;  %486 = vmatpush.msra.mxu2 %v117_v41  ;;  %v96_v0 = vld [vmem:[#allocation5 + $0x80] sm:$0xff]  ;;  %v175_v3 = vld [vmem:[#allocation5 + $0x2f8] sm:$0xff]  ;;  %v190_v4 = vld [vmem:[#allocation5 + $0x370] sm:$0xff] }
  0x25   :  { %466 = vmatpush.msra.mxu1 %v101_v42  ;;  %447 = vmatpush.msra.mxu0 %v84_v44  ;;  %v128_v1 = vld [vmem:[#allocation5 + $0x180] sm:$0xff]  ;;  %v207_v5 = vld [vmem:[#allocation5 + $0x3f8] sm:$0xff]  ;;  %v157_v6 = vld [vmem:[#allocation5 + $0x268] sm:$0xff] }
  0x26   :  { %506 = vmatpush.msra.mxu3 %v133_v43  ;;  %487 = vmatpush.msra.mxu2 %v116_v45  ;;  %v174_v7 = vld [vmem:[#allocation5 + $0x2f0] sm:$0xff]  ;;  %v189_v8 = vld [vmem:[#allocation5 + $0x368] sm:$0xff]  ;;  %v156_v10 = vld [vmem:[#allocation5 + $0x260] sm:$0xff] }
  0x27   :  { %467 = vmatpush.msra.mxu1 %v100_v46  ;;  %448 = vmatpush.msra.mxu0 %v83_v48  ;;  %v206_v9 = vld [vmem:[#allocation5 + $0x3f0] sm:$0xff]  ;;  %v173_v11 = vld [vmem:[#allocation5 + $0x2e8] sm:$0xff]  ;;  %v188_v12 = vld [vmem:[#allocation5 + $0x360] sm:$0xff] }
  0x28   :  { %507 = vmatpush.msra.mxu3 %v132_v47  ;;  %488 = vmatpush.msra.mxu2 %v115_v49  ;;  %v205_v13 = vld [vmem:[#allocation5 + $0x3e8] sm:$0xff]  ;;  %v155_v14 = vld [vmem:[#allocation5 + $0x258] sm:$0xff]  ;;  %v172_v15 = vld [vmem:[#allocation5 + $0x2e0] sm:$0xff] }
  0x29   :  { %468 = vmatpush.msra.mxu1 %v99_v50  ;;  %449 = vmatpush.msra.mxu0 %v82_v52  ;;  %v187_v16 = vld [vmem:[#allocation5 + $0x358] sm:$0xff]  ;;  %v204_v17 = vld [vmem:[#allocation5 + $0x3e0] sm:$0xff]  ;;  %v154_v18 = vld [vmem:[#allocation5 + $0x250] sm:$0xff] }
  0x2a   :  { %508 = vmatpush.msra.mxu3 %v131_v51  ;;  %489 = vmatpush.msra.mxu2 %v114_v53  ;;  %v171_v19 = vld [vmem:[#allocation5 + $0x2d8] sm:$0xff]  ;;  %v186_v20 = vld [vmem:[#allocation5 + $0x350] sm:$0xff]  ;;  %v153_v22 = vld [vmem:[#allocation5 + $0x248] sm:$0xff] }
  0x2b   :  { %469 = vmatpush.msra.mxu1 %v98_v54  ;;  %450 = vmatpush.msra.mxu0 %v81_v56  ;;  %v203_v21 = vld [vmem:[#allocation5 + $0x3d8] sm:$0xff]  ;;  %v170_v23 = vld [vmem:[#allocation5 + $0x2d0] sm:$0xff]  ;;  %v185_v24 = vld [vmem:[#allocation5 + $0x348] sm:$0xff] }
  0x2c   :  { %509 = vmatpush.msra.mxu3 %v130_v55  ;;  %490 = vmatpush.msra.mxu2 %v113_v57  ;;  %v202_v25 = vld [vmem:[#allocation5 + $0x3d0] sm:$0xff]  ;;  %v152_v26 = vld [vmem:[#allocation5 + $0x240] sm:$0xff]  ;;  %v169_v27 = vld [vmem:[#allocation5 + $0x2c8] sm:$0xff] }
  0x2d   :  { %470 = vmatpush.msra.mxu1 %v97_v58  ;;  %451 = vmatpush.msra.mxu0 %v80_v60  ;;  %v184_v28 = vld [vmem:[#allocation5 + $0x340] sm:$0xff]  ;;  %v201_v29 = vld [vmem:[#allocation5 + $0x3c8] sm:$0xff]  ;;  %v151_v30 = vld [vmem:[#allocation5 + $0x238] sm:$0xff] }
  0x2e   :  { %510 = vmatpush.msra.mxu3 %v129_v59  ;;  %491 = vmatpush.msra.mxu2 %v112_v61  ;;  %v168_v31 = vld [vmem:[#allocation5 + $0x2c0] sm:$0xff]  ;;  %v183_v32 = vld [vmem:[#allocation5 + $0x338] sm:$0xff]  ;;  %v150_v34 = vld [vmem:[#allocation5 + $0x230] sm:$0xff] }
  0x2f   :  { %516 = vmatpush.msrb.mxu0 %v159_v62  ;;  %471 = vmatpush.msra.mxu1 %v96_v0  ;;  %v200_v33 = vld [vmem:[#allocation5 + $0x3c0] sm:$0xff]  ;;  %v167_v35 = vld [vmem:[#allocation5 + $0x2b8] sm:$0xff]  ;;  %v182_v36 = vld [vmem:[#allocation5 + $0x330] sm:$0xff] }
  0x30   :  { %556 = vmatpush.msrb.mxu2 %v191_v63  ;;  %511 = vmatpush.msra.mxu3 %v128_v1  ;;  %v199_v37 = vld [vmem:[#allocation5 + $0x3b8] sm:$0xff]  ;;  %v149_v38 = vld [vmem:[#allocation5 + $0x228] sm:$0xff]  ;;  %v166_v39 = vld [vmem:[#allocation5 + $0x2b0] sm:$0xff] }
  0x31   :  { %517 = vmatpush.msrb.mxu0 %v158_v2  ;;  %536 = vmatpush.msrb.mxu1 %v175_v3  ;;  %v181_v40 = vld [vmem:[#allocation5 + $0x328] sm:$0xff]  ;;  %v198_v41 = vld [vmem:[#allocation5 + $0x3b0] sm:$0xff]  ;;  %v148_v42 = vld [vmem:[#allocation5 + $0x220] sm:$0xff] }
  0x32   :  { %557 = vmatpush.msrb.mxu2 %v190_v4  ;;  %576 = vmatpush.msrb.mxu3 %v207_v5  ;;  %v165_v43 = vld [vmem:[#allocation5 + $0x2a8] sm:$0xff]  ;;  %v180_v44 = vld [vmem:[#allocation5 + $0x320] sm:$0xff]  ;;  %v147_v46 = vld [vmem:[#allocation5 + $0x218] sm:$0xff] }
  0x33   :  { %518 = vmatpush.msrb.mxu0 %v157_v6  ;;  %537 = vmatpush.msrb.mxu1 %v174_v7  ;;  %v197_v45 = vld [vmem:[#allocation5 + $0x3a8] sm:$0xff]  ;;  %v164_v47 = vld [vmem:[#allocation5 + $0x2a0] sm:$0xff]  ;;  %v179_v48 = vld [vmem:[#allocation5 + $0x318] sm:$0xff] }
  0x34   :  { %558 = vmatpush.msrb.mxu2 %v189_v8  ;;  %577 = vmatpush.msrb.mxu3 %v206_v9  ;;  %v196_v49 = vld [vmem:[#allocation5 + $0x3a0] sm:$0xff]  ;;  %v146_v50 = vld [vmem:[#allocation5 + $0x210] sm:$0xff]  ;;  %v163_v51 = vld [vmem:[#allocation5 + $0x298] sm:$0xff] }
  0x35   :  { %519 = vmatpush.msrb.mxu0 %v156_v10  ;;  %538 = vmatpush.msrb.mxu1 %v173_v11  ;;  %v178_v52 = vld [vmem:[#allocation5 + $0x310] sm:$0xff]  ;;  %v195_v53 = vld [vmem:[#allocation5 + $0x398] sm:$0xff]  ;;  %v145_v54 = vld [vmem:[#allocation5 + $0x208] sm:$0xff] }
  0x36   :  { %559 = vmatpush.msrb.mxu2 %v188_v12  ;;  %578 = vmatpush.msrb.mxu3 %v205_v13  ;;  %v162_v55 = vld [vmem:[#allocation5 + $0x290] sm:$0xff]  ;;  %v177_v56 = vld [vmem:[#allocation5 + $0x308] sm:$0xff]  ;;  %v60_v58 = vld [vmem:[#allocation2 + $0x10] sm:$0xff] }
  0x37   :  { %520 = vmatpush.msrb.mxu0 %v155_v14  ;;  %539 = vmatpush.msrb.mxu1 %v172_v15  ;;  %v194_v57 = vld [vmem:[#allocation5 + $0x390] sm:$0xff]  ;;  %v144_v59 = vld [vmem:[#allocation5 + $0x200] sm:$0xff]  ;;  %v161_v60 = vld [vmem:[#allocation5 + $0x288] sm:$0xff] }
  0x38   :  { %560 = vmatpush.msrb.mxu2 %v187_v16  ;;  %579 = vmatpush.msrb.mxu3 %v204_v17  ;;  %v176_v61 = vld [vmem:[#allocation5 + $0x300] sm:$0xff]  ;;  %v193_v62 = vld [vmem:[#allocation5 + $0x388] sm:$0xff]  ;;  %v58_v63 = vld [vmem:[#allocation2] sm:$0xff] }
  0x39   :  { %521 = vmatpush.msrb.mxu0 %v154_v18  ;;  %540 = vmatpush.msrb.mxu1 %v171_v19  ;;  %v61_v0 = vld [vmem:[#allocation2 + $0x18] sm:$0xff]  ;;  %v223_v1 = vld [vmem:[#allocation5 + $0x478] sm:$0xff]  ;;  %v160_v3 = vld [vmem:[#allocation5 + $0x280] sm:$0xff] }
  0x3a   :  { %561 = vmatpush.msrb.mxu2 %v186_v20  ;;  %580 = vmatpush.msrb.mxu3 %v203_v21  ;;  %v255_v2 = vld [vmem:[#allocation5 + $0x578] sm:$0xff]  ;;  %v192_v4 = vld [vmem:[#allocation5 + $0x380] sm:$0xff]  ;;  %v222_v6 = vld [vmem:[#allocation5 + $0x470] sm:$0xff] }
  0x3b   :  { %522 = vmatpush.msrb.mxu0 %v153_v22  ;;  %541 = vmatpush.msrb.mxu1 %v170_v23  ;;  %v59_v5 = vld [vmem:[#allocation2 + $0x8] sm:$0xff]  ;;  %v254_v8 = vld [vmem:[#allocation5 + $0x570] sm:$0xff]  ;;  %v221_v10 = vld [vmem:[#allocation5 + $0x468] sm:$0xff] }
  0x3c   :  { %562 = vmatpush.msrb.mxu2 %v185_v24  ;;  %581 = vmatpush.msrb.mxu3 %v202_v25  ;;  %v239_v7 = vld [vmem:[#allocation5 + $0x4f8] sm:$0xff]  ;;  %v238_v11 = vld [vmem:[#allocation5 + $0x4f0] sm:$0xff]  ;;  %v253_v12 = vld [vmem:[#allocation5 + $0x568] sm:$0xff] }
  0x3d   :  { %523 = vmatpush.msrb.mxu0 %v152_v26  ;;  %542 = vmatpush.msrb.mxu1 %v169_v27  ;;  %v271_v9 = vld [vmem:[#allocation5 + $0x5f8] sm:$0xff]  ;;  %v270_v13 = vld [vmem:[#allocation5 + $0x5f0] sm:$0xff]  ;;  %v64_v14 = vld [vmem:[#allocation2 + $0x30] sm:$0xff] }
  0x3e   :  { %563 = vmatpush.msrb.mxu2 %v184_v28  ;;  %582 = vmatpush.msrb.mxu3 %v201_v29  ;;  %v220_v15 = vld [vmem:[#allocation5 + $0x460] sm:$0xff]  ;;  %v237_v16 = vld [vmem:[#allocation5 + $0x4e8] sm:$0xff]  ;;  %v62_v19 = vld [vmem:[#allocation2 + $0x20] sm:$0xff] }
  0x3f   :  { %524 = vmatpush.msrb.mxu0 %v151_v30  ;;  %543 = vmatpush.msrb.mxu1 %v168_v31  ;;  %v252_v17 = vld [vmem:[#allocation5 + $0x560] sm:$0xff]  ;;  %v269_v18 = vld [vmem:[#allocation5 + $0x5e8] sm:$0xff]  ;;  %v219_v21 = vld [vmem:[#allocation5 + $0x458] sm:$0xff] }
  0x40   :  { %564 = vmatpush.msrb.mxu2 %v183_v32  ;;  %583 = vmatpush.msrb.mxu3 %v200_v33  ;;  %v65_v20 = vld [vmem:[#allocation2 + $0x38] sm:$0xff]  ;;  %v236_v22 = vld [vmem:[#allocation5 + $0x4e0] sm:$0xff]  ;;  %v251_v23 = vld [vmem:[#allocation5 + $0x558] sm:$0xff] }
  0x41   :  { %525 = vmatpush.msrb.mxu0 %v150_v34  ;;  %544 = vmatpush.msrb.mxu1 %v167_v35  ;;  %v268_v24 = vld [vmem:[#allocation5 + $0x5e0] sm:$0xff]  ;;  %v63_v25 = vld [vmem:[#allocation2 + $0x28] sm:$0xff]  ;;  %v218_v26 = vld [vmem:[#allocation5 + $0x450] sm:$0xff] }
  0x42   :  { %565 = vmatpush.msrb.mxu2 %v182_v36  ;;  %584 = vmatpush.msrb.mxu3 %v199_v37  ;;  %v235_v27 = vld [vmem:[#allocation5 + $0x4d8] sm:$0xff]  ;;  %v250_v28 = vld [vmem:[#allocation5 + $0x550] sm:$0xff]  ;;  %v217_v30 = vld [vmem:[#allocation5 + $0x448] sm:$0xff] }
  0x43   :  { %526 = vmatpush.msrb.mxu0 %v149_v38  ;;  %545 = vmatpush.msrb.mxu1 %v166_v39  ;;  %v267_v29 = vld [vmem:[#allocation5 + $0x5d8] sm:$0xff]  ;;  %v234_v31 = vld [vmem:[#allocation5 + $0x4d0] sm:$0xff]  ;;  %v249_v32 = vld [vmem:[#allocation5 + $0x548] sm:$0xff] }
  0x44   :  { %566 = vmatpush.msrb.mxu2 %v181_v40  ;;  %585 = vmatpush.msrb.mxu3 %v198_v41  ;;  %v266_v33 = vld [vmem:[#allocation5 + $0x5d0] sm:$0xff]  ;;  %v216_v34 = vld [vmem:[#allocation5 + $0x440] sm:$0xff]  ;;  %v233_v35 = vld [vmem:[#allocation5 + $0x4c8] sm:$0xff] }
  0x45   :  { %527 = vmatpush.msrb.mxu0 %v148_v42  ;;  %546 = vmatpush.msrb.mxu1 %v165_v43  ;;  %v248_v36 = vld [vmem:[#allocation5 + $0x540] sm:$0xff]  ;;  %v265_v37 = vld [vmem:[#allocation5 + $0x5c8] sm:$0xff]  ;;  %v215_v38 = vld [vmem:[#allocation5 + $0x438] sm:$0xff] }
  0x46   :  { %567 = vmatpush.msrb.mxu2 %v180_v44  ;;  %586 = vmatpush.msrb.mxu3 %v197_v45  ;;  %v232_v39 = vld [vmem:[#allocation5 + $0x4c0] sm:$0xff]  ;;  %v247_v40 = vld [vmem:[#allocation5 + $0x538] sm:$0xff]  ;;  %v214_v42 = vld [vmem:[#allocation5 + $0x430] sm:$0xff] }
  0x47   :  { %528 = vmatpush.msrb.mxu0 %v147_v46  ;;  %547 = vmatpush.msrb.mxu1 %v164_v47  ;;  %v264_v41 = vld [vmem:[#allocation5 + $0x5c0] sm:$0xff]  ;;  %v231_v43 = vld [vmem:[#allocation5 + $0x4b8] sm:$0xff]  ;;  %v246_v44 = vld [vmem:[#allocation5 + $0x530] sm:$0xff] }
  0x48   :  { %568 = vmatpush.msrb.mxu2 %v179_v48  ;;  %587 = vmatpush.msrb.mxu3 %v196_v49  ;;  %v263_v45 = vld [vmem:[#allocation5 + $0x5b8] sm:$0xff]  ;;  %v213_v46 = vld [vmem:[#allocation5 + $0x428] sm:$0xff]  ;;  %v230_v47 = vld [vmem:[#allocation5 + $0x4b0] sm:$0xff] }
  0x49   :  { %529 = vmatpush.msrb.mxu0 %v146_v50  ;;  %548 = vmatpush.msrb.mxu1 %v163_v51  ;;  %v245_v48 = vld [vmem:[#allocation5 + $0x528] sm:$0xff]  ;;  %v262_v49 = vld [vmem:[#allocation5 + $0x5b0] sm:$0xff]  ;;  %v212_v50 = vld [vmem:[#allocation5 + $0x420] sm:$0xff] }
  0x4a   :  { %569 = vmatpush.msrb.mxu2 %v178_v52  ;;  %588 = vmatpush.msrb.mxu3 %v195_v53  ;;  %v229_v51 = vld [vmem:[#allocation5 + $0x4a8] sm:$0xff]  ;;  %v244_v52 = vld [vmem:[#allocation5 + $0x520] sm:$0xff] }
  0x4b   :  { %530 = vmatpush.msrb.mxu0 %v145_v54  ;;  %549 = vmatpush.msrb.mxu1 %v162_v55  ;;  %v261_v53 = vld [vmem:[#allocation5 + $0x5a8] sm:$0xff]  ;;  %v211_v54 = vld [vmem:[#allocation5 + $0x418] sm:$0xff]  ;;  %v228_v55 = vld [vmem:[#allocation5 + $0x4a0] sm:$0xff] }
  0x4c   :  { %570 = vmatpush.msrb.mxu2 %v177_v56  ;;  %589 = vmatpush.msrb.mxu3 %v194_v57  ;;  %v243_v56 = vld [vmem:[#allocation5 + $0x518] sm:$0xff]  ;;  %v260_v57 = vld [vmem:[#allocation5 + $0x5a0] sm:$0xff] }
  0x4d   :  { %492 = vmatmul.f32.vlgmr.msra.gmra.mxu2 %v60_v58  ;;  %531 = vmatpush.msrb.mxu0 %v144_v59  ;;  %v210_v58 = vld [vmem:[#allocation5 + $0x410] sm:$0xff]  ;;  %v227_v59 = vld [vmem:[#allocation5 + $0x498] sm:$0xff] }
  0x4e   :  { %550 = vmatpush.msrb.mxu1 %v161_v60  ;;  %571 = vmatpush.msrb.mxu2 %v176_v61  ;;  %v242_v60 = vld [vmem:[#allocation5 + $0x510] sm:$0xff]  ;;  %v259_v61 = vld [vmem:[#allocation5 + $0x598] sm:$0xff] }
  0x4f   :  { %590 = vmatpush.msrb.mxu3 %v193_v62  ;;  %452 = vmatmul.f32.vlgmr.msra.gmra.mxu0 %v58_v63  ;;  %v209_v62 = vld [vmem:[#allocation5 + $0x408] sm:$0xff]  ;;  %v226_v63 = vld [vmem:[#allocation5 + $0x490] sm:$0xff] }
  0x50   :  { %512 = vmatmul.f32.vlgmr.msra.gmra.mxu3 %v61_v0  ;;  %596 = vmatpush.msra.mxu0 %v223_v1  ;;  %v241_v0 = vld [vmem:[#allocation5 + $0x508] sm:$0xff]  ;;  %v258_v1 = vld [vmem:[#allocation5 + $0x590] sm:$0xff] }
  0x51   :  { %636 = vmatpush.msra.mxu2 %v255_v2  ;;  %551 = vmatpush.msrb.mxu1 %v160_v3  ;;  %v208_v2 = vld [vmem:[#allocation5 + $0x400] sm:$0xff]  ;;  %v225_v3 = vld [vmem:[#allocation5 + $0x488] sm:$0xff] }
  0x52   :  { %591 = vmatpush.msrb.mxu3 %v192_v4  ;;  %472 = vmatmul.f32.vlgmr.msra.gmra.mxu1 %v59_v5  ;;  %v240_v4 = vld [vmem:[#allocation5 + $0x500] sm:$0xff]  ;;  %v257_v5 = vld [vmem:[#allocation5 + $0x588] sm:$0xff] }
  0x53   :  { %597 = vmatpush.msra.mxu0 %v222_v6  ;;  %616 = vmatpush.msra.mxu1 %v239_v7  ;;  %v66_v6 = vld [vmem:[#allocation2 + $0x40] sm:$0xff]  ;;  %v68_v7 = vld [vmem:[#allocation2 + $0x50] sm:$0xff] }
  0x54   :  { %637 = vmatpush.msra.mxu2 %v254_v8  ;;  %656 = vmatpush.msra.mxu3 %v271_v9  ;;  %v287_v8 = vld [vmem:[#allocation5 + $0x678] sm:$0xff] }
  0x55   :  { %598 = vmatpush.msra.mxu0 %v221_v10  ;;  %617 = vmatpush.msra.mxu1 %v238_v11  ;;  %v319_v9 = vld [vmem:[#allocation5 + $0x778] sm:$0xff]  ;;  %v224_v10 = vld [vmem:[#allocation5 + $0x480] sm:$0xff] }
  0x56   :  { %638 = vmatpush.msra.mxu2 %v253_v12  ;;  %657 = vmatpush.msra.mxu3 %v270_v13  ;;  %v256_v11 = vld [vmem:[#allocation5 + $0x580] sm:$0xff]  ;;  %v67_v12 = vld [vmem:[#allocation2 + $0x48] sm:$0xff]  ;;  %v69_v13 = vld [vmem:[#allocation2 + $0x58] sm:$0xff] }
  0x57   :  { %572 = vmatmul.f32.vlgmr.msrb.gmra.mxu2 %v64_v14  ;;  %599 = vmatpush.msra.mxu0 %v220_v15  ;;  %v286_v14 = vld [vmem:[#allocation5 + $0x670] sm:$0xff]  ;;  %v303_v15 = vld [vmem:[#allocation5 + $0x6f8] sm:$0xff] }
  0x58   :  { %618 = vmatpush.msra.mxu1 %v237_v16  ;;  %639 = vmatpush.msra.mxu2 %v252_v17  ;;  %v318_v16 = vld [vmem:[#allocation5 + $0x770] sm:$0xff]  ;;  %v335_v17 = vld [vmem:[#allocation5 + $0x7f8] sm:$0xff] }
  0x59   :  { %658 = vmatpush.msra.mxu3 %v269_v18  ;;  %532 = vmatmul.f32.vlgmr.msrb.gmra.mxu0 %v62_v19  ;;  %v285_v18 = vld [vmem:[#allocation5 + $0x668] sm:$0xff]  ;;  %v302_v19 = vld [vmem:[#allocation5 + $0x6f0] sm:$0xff] }
  0x5a   :  { %592 = vmatmul.f32.vlgmr.msrb.gmra.mxu3 %v65_v20  ;;  %600 = vmatpush.msra.mxu0 %v219_v21  ;;  %v317_v20 = vld [vmem:[#allocation5 + $0x768] sm:$0xff]  ;;  %v334_v21 = vld [vmem:[#allocation5 + $0x7f0] sm:$0xff] }
  0x5b   :  { %619 = vmatpush.msra.mxu1 %v236_v22  ;;  %640 = vmatpush.msra.mxu2 %v251_v23  ;;  %v284_v22 = vld [vmem:[#allocation5 + $0x660] sm:$0xff]  ;;  %v301_v23 = vld [vmem:[#allocation5 + $0x6e8] sm:$0xff] }
  0x5c   :  { %659 = vmatpush.msra.mxu3 %v268_v24  ;;  %552 = vmatmul.f32.vlgmr.msrb.gmra.mxu1 %v63_v25  ;;  %v316_v24 = vld [vmem:[#allocation5 + $0x760] sm:$0xff]  ;;  %v333_v25 = vld [vmem:[#allocation5 + $0x7e8] sm:$0xff] }
  0x5d   :  { %601 = vmatpush.msra.mxu0 %v218_v26  ;;  %620 = vmatpush.msra.mxu1 %v235_v27  ;;  %v283_v26 = vld [vmem:[#allocation5 + $0x658] sm:$0xff]  ;;  %v300_v27 = vld [vmem:[#allocation5 + $0x6e0] sm:$0xff] }
  0x5e   :  { %641 = vmatpush.msra.mxu2 %v250_v28  ;;  %660 = vmatpush.msra.mxu3 %v267_v29  ;;  %v315_v28 = vld [vmem:[#allocation5 + $0x758] sm:$0xff]  ;;  %v332_v29 = vld [vmem:[#allocation5 + $0x7e0] sm:$0xff] }
  0x5f   :  { %602 = vmatpush.msra.mxu0 %v217_v30  ;;  %621 = vmatpush.msra.mxu1 %v234_v31  ;;  %v282_v30 = vld [vmem:[#allocation5 + $0x650] sm:$0xff]  ;;  %v299_v31 = vld [vmem:[#allocation5 + $0x6d8] sm:$0xff] }
  0x60   :  { %642 = vmatpush.msra.mxu2 %v249_v32  ;;  %661 = vmatpush.msra.mxu3 %v266_v33  ;;  %v314_v32 = vld [vmem:[#allocation5 + $0x750] sm:$0xff]  ;;  %v331_v33 = vld [vmem:[#allocation5 + $0x7d8] sm:$0xff] }
  0x61   :  { %603 = vmatpush.msra.mxu0 %v216_v34  ;;  %622 = vmatpush.msra.mxu1 %v233_v35  ;;  %v281_v34 = vld [vmem:[#allocation5 + $0x648] sm:$0xff]  ;;  %v298_v35 = vld [vmem:[#allocation5 + $0x6d0] sm:$0xff] }
  0x62   :  { %643 = vmatpush.msra.mxu2 %v248_v36  ;;  %662 = vmatpush.msra.mxu3 %v265_v37  ;;  %v313_v36 = vld [vmem:[#allocation5 + $0x748] sm:$0xff]  ;;  %v330_v37 = vld [vmem:[#allocation5 + $0x7d0] sm:$0xff] }
  0x63   :  { %604 = vmatpush.msra.mxu0 %v215_v38  ;;  %623 = vmatpush.msra.mxu1 %v232_v39  ;;  %v280_v38 = vld [vmem:[#allocation5 + $0x640] sm:$0xff]  ;;  %v297_v39 = vld [vmem:[#allocation5 + $0x6c8] sm:$0xff] }
  0x64   :  { %644 = vmatpush.msra.mxu2 %v247_v40  ;;  %663 = vmatpush.msra.mxu3 %v264_v41  ;;  %v312_v40 = vld [vmem:[#allocation5 + $0x740] sm:$0xff]  ;;  %v329_v41 = vld [vmem:[#allocation5 + $0x7c8] sm:$0xff] }
  0x65   :  { %605 = vmatpush.msra.mxu0 %v214_v42  ;;  %624 = vmatpush.msra.mxu1 %v231_v43  ;;  %v279_v42 = vld [vmem:[#allocation5 + $0x638] sm:$0xff]  ;;  %v296_v43 = vld [vmem:[#allocation5 + $0x6c0] sm:$0xff] }
  0x66   :  { %645 = vmatpush.msra.mxu2 %v246_v44  ;;  %664 = vmatpush.msra.mxu3 %v263_v45  ;;  %v311_v44 = vld [vmem:[#allocation5 + $0x738] sm:$0xff]  ;;  %v328_v45 = vld [vmem:[#allocation5 + $0x7c0] sm:$0xff] }
  0x67   :  { %606 = vmatpush.msra.mxu0 %v213_v46  ;;  %625 = vmatpush.msra.mxu1 %v230_v47  ;;  %v278_v46 = vld [vmem:[#allocation5 + $0x630] sm:$0xff]  ;;  %v295_v47 = vld [vmem:[#allocation5 + $0x6b8] sm:$0xff] }
  0x68   :  { %646 = vmatpush.msra.mxu2 %v245_v48  ;;  %665 = vmatpush.msra.mxu3 %v262_v49  ;;  %v310_v48 = vld [vmem:[#allocation5 + $0x730] sm:$0xff]  ;;  %v327_v49 = vld [vmem:[#allocation5 + $0x7b8] sm:$0xff] }
  0x69   :  { %607 = vmatpush.msra.mxu0 %v212_v50  ;;  %626 = vmatpush.msra.mxu1 %v229_v51  ;;  %v277_v50 = vld [vmem:[#allocation5 + $0x628] sm:$0xff]  ;;  %v294_v51 = vld [vmem:[#allocation5 + $0x6b0] sm:$0xff] }
  0x6a   :  { %647 = vmatpush.msra.mxu2 %v244_v52  ;;  %666 = vmatpush.msra.mxu3 %v261_v53  ;;  %v309_v52 = vld [vmem:[#allocation5 + $0x728] sm:$0xff]  ;;  %v326_v53 = vld [vmem:[#allocation5 + $0x7b0] sm:$0xff] }
  0x6b   :  { %608 = vmatpush.msra.mxu0 %v211_v54  ;;  %627 = vmatpush.msra.mxu1 %v228_v55  ;;  %v276_v54 = vld [vmem:[#allocation5 + $0x620] sm:$0xff]  ;;  %v293_v55 = vld [vmem:[#allocation5 + $0x6a8] sm:$0xff] }
  0x6c   :  { %648 = vmatpush.msra.mxu2 %v243_v56  ;;  %667 = vmatpush.msra.mxu3 %v260_v57  ;;  %v308_v56 = vld [vmem:[#allocation5 + $0x720] sm:$0xff]  ;;  %v325_v57 = vld [vmem:[#allocation5 + $0x7a8] sm:$0xff] }
  0x6d   :  { %609 = vmatpush.msra.mxu0 %v210_v58  ;;  %628 = vmatpush.msra.mxu1 %v227_v59  ;;  %v275_v58 = vld [vmem:[#allocation5 + $0x618] sm:$0xff]  ;;  %v292_v59 = vld [vmem:[#allocation5 + $0x6a0] sm:$0xff] }
  0x6e   :  { %649 = vmatpush.msra.mxu2 %v242_v60  ;;  %668 = vmatpush.msra.mxu3 %v259_v61  ;;  %v307_v60 = vld [vmem:[#allocation5 + $0x718] sm:$0xff]  ;;  %v324_v61 = vld [vmem:[#allocation5 + $0x7a0] sm:$0xff] }
  0x6f   :  { %610 = vmatpush.msra.mxu0 %v209_v62  ;;  %629 = vmatpush.msra.mxu1 %v226_v63  ;;  %v274_v62 = vld [vmem:[#allocation5 + $0x610] sm:$0xff]  ;;  %v291_v63 = vld [vmem:[#allocation5 + $0x698] sm:$0xff] }
  0x70   :  { %650 = vmatpush.msra.mxu2 %v241_v0  ;;  %669 = vmatpush.msra.mxu3 %v258_v1  ;;  %v306_v0 = vld [vmem:[#allocation5 + $0x710] sm:$0xff]  ;;  %v323_v1 = vld [vmem:[#allocation5 + $0x798] sm:$0xff] }
  0x71   :  { %611 = vmatpush.msra.mxu0 %v208_v2  ;;  %630 = vmatpush.msra.mxu1 %v225_v3  ;;  %v273_v2 = vld [vmem:[#allocation5 + $0x608] sm:$0xff]  ;;  %v290_v3 = vld [vmem:[#allocation5 + $0x690] sm:$0xff] }
  0x72   :  { %651 = vmatpush.msra.mxu2 %v240_v4  ;;  %670 = vmatpush.msra.mxu3 %v257_v5  ;;  %v305_v4 = vld [vmem:[#allocation5 + $0x708] sm:$0xff]  ;;  %v322_v5 = vld [vmem:[#allocation5 + $0x790] sm:$0xff] }
  0x73   :  { %612 = vmatmul.f32.vlgmr.msra.gmra.mxu0 %v66_v6  ;;  %652 = vmatmul.f32.vlgmr.msra.gmra.mxu2 %v68_v7  ;;  %v272_v6 = vld [vmem:[#allocation5 + $0x600] sm:$0xff]  ;;  %v289_v7 = vld [vmem:[#allocation5 + $0x688] sm:$0xff] }
  0x74   :  { %676 = vmatpush.msrb.mxu0 %v287_v8  ;;  %716 = vmatpush.msrb.mxu2 %v319_v9  ;;  %v304_v8 = vld [vmem:[#allocation5 + $0x700] sm:$0xff]  ;;  %v321_v9 = vld [vmem:[#allocation5 + $0x788] sm:$0xff] }
  0x75   :  { %631 = vmatpush.msra.mxu1 %v224_v10  ;;  %671 = vmatpush.msra.mxu3 %v256_v11  ;;  %v70_v10 = vld [vmem:[#allocation2 + $0x60] sm:$0xff]  ;;  %v72_v11 = vld [vmem:[#allocation2 + $0x70] sm:$0xff] }
  0x76   :  { %632 = vmatmul.f32.vlgmr.msra.gmra.mxu1 %v67_v12  ;;  %672 = vmatmul.f32.vlgmr.msra.gmra.mxu3 %v69_v13  ;;  %v351_v12 = vld [vmem:[#allocation5 + $0x878] sm:$0xff] }
  0x77   :  { %677 = vmatpush.msrb.mxu0 %v286_v14  ;;  %696 = vmatpush.msrb.mxu1 %v303_v15  ;;  %v383_v13 = vld [vmem:[#allocation5 + $0x978] sm:$0xff]  ;;  %v288_v14 = vld [vmem:[#allocation5 + $0x680] sm:$0xff] }
  0x78   :  { %717 = vmatpush.msrb.mxu2 %v318_v16  ;;  %736 = vmatpush.msrb.mxu3 %v335_v17  ;;  %v320_v15 = vld [vmem:[#allocation5 + $0x780] sm:$0xff]  ;;  %v71_v16 = vld [vmem:[#allocation2 + $0x68] sm:$0xff]  ;;  %v73_v17 = vld [vmem:[#allocation2 + $0x78] sm:$0xff] }
  0x79   :  { %678 = vmatpush.msrb.mxu0 %v285_v18  ;;  %697 = vmatpush.msrb.mxu1 %v302_v19  ;;  %v350_v18 = vld [vmem:[#allocation5 + $0x870] sm:$0xff]  ;;  %v367_v19 = vld [vmem:[#allocation5 + $0x8f8] sm:$0xff] }
  0x7a   :  { %718 = vmatpush.msrb.mxu2 %v317_v20  ;;  %737 = vmatpush.msrb.mxu3 %v334_v21  ;;  %v382_v20 = vld [vmem:[#allocation5 + $0x970] sm:$0xff]  ;;  %v399_v21 = vld [vmem:[#allocation5 + $0x9f8] sm:$0xff] }
  0x7b   :  { %679 = vmatpush.msrb.mxu0 %v284_v22  ;;  %698 = vmatpush.msrb.mxu1 %v301_v23  ;;  %v349_v22 = vld [vmem:[#allocation5 + $0x868] sm:$0xff]  ;;  %v366_v23 = vld [vmem:[#allocation5 + $0x8f0] sm:$0xff] }
  0x7c   :  { %719 = vmatpush.msrb.mxu2 %v316_v24  ;;  %738 = vmatpush.msrb.mxu3 %v333_v25  ;;  %v381_v24 = vld [vmem:[#allocation5 + $0x968] sm:$0xff]  ;;  %v398_v25 = vld [vmem:[#allocation5 + $0x9f0] sm:$0xff] }
  0x7d   :  { %680 = vmatpush.msrb.mxu0 %v283_v26  ;;  %699 = vmatpush.msrb.mxu1 %v300_v27  ;;  %v348_v26 = vld [vmem:[#allocation5 + $0x860] sm:$0xff]  ;;  %v365_v27 = vld [vmem:[#allocation5 + $0x8e8] sm:$0xff] }
  0x7e   :  { %720 = vmatpush.msrb.mxu2 %v315_v28  ;;  %739 = vmatpush.msrb.mxu3 %v332_v29  ;;  %v380_v28 = vld [vmem:[#allocation5 + $0x960] sm:$0xff]  ;;  %v397_v29 = vld [vmem:[#allocation5 + $0x9e8] sm:$0xff] }
  0x7f   :  { %681 = vmatpush.msrb.mxu0 %v282_v30  ;;  %700 = vmatpush.msrb.mxu1 %v299_v31  ;;  %v347_v30 = vld [vmem:[#allocation5 + $0x858] sm:$0xff]  ;;  %v364_v31 = vld [vmem:[#allocation5 + $0x8e0] sm:$0xff] }
  0x80   :  { %721 = vmatpush.msrb.mxu2 %v314_v32  ;;  %740 = vmatpush.msrb.mxu3 %v331_v33  ;;  %v379_v32 = vld [vmem:[#allocation5 + $0x958] sm:$0xff]  ;;  %v396_v33 = vld [vmem:[#allocation5 + $0x9e0] sm:$0xff] }
  0x81   :  { %682 = vmatpush.msrb.mxu0 %v281_v34  ;;  %701 = vmatpush.msrb.mxu1 %v298_v35  ;;  %v346_v34 = vld [vmem:[#allocation5 + $0x850] sm:$0xff]  ;;  %v363_v35 = vld [vmem:[#allocation5 + $0x8d8] sm:$0xff] }
  0x82   :  { %722 = vmatpush.msrb.mxu2 %v313_v36  ;;  %741 = vmatpush.msrb.mxu3 %v330_v37  ;;  %v378_v36 = vld [vmem:[#allocation5 + $0x950] sm:$0xff]  ;;  %v395_v37 = vld [vmem:[#allocation5 + $0x9d8] sm:$0xff] }
  0x83   :  { %683 = vmatpush.msrb.mxu0 %v280_v38  ;;  %702 = vmatpush.msrb.mxu1 %v297_v39  ;;  %v345_v38 = vld [vmem:[#allocation5 + $0x848] sm:$0xff]  ;;  %v362_v39 = vld [vmem:[#allocation5 + $0x8d0] sm:$0xff] }
  0x84   :  { %723 = vmatpush.msrb.mxu2 %v312_v40  ;;  %742 = vmatpush.msrb.mxu3 %v329_v41  ;;  %v377_v40 = vld [vmem:[#allocation5 + $0x948] sm:$0xff]  ;;  %v394_v41 = vld [vmem:[#allocation5 + $0x9d0] sm:$0xff] }
  0x85   :  { %684 = vmatpush.msrb.mxu0 %v279_v42  ;;  %703 = vmatpush.msrb.mxu1 %v296_v43  ;;  %v344_v42 = vld [vmem:[#allocation5 + $0x840] sm:$0xff]  ;;  %v361_v43 = vld [vmem:[#allocation5 + $0x8c8] sm:$0xff] }
  0x86   :  { %724 = vmatpush.msrb.mxu2 %v311_v44  ;;  %743 = vmatpush.msrb.mxu3 %v328_v45  ;;  %v376_v44 = vld [vmem:[#allocation5 + $0x940] sm:$0xff]  ;;  %v393_v45 = vld [vmem:[#allocation5 + $0x9c8] sm:$0xff] }
  0x87   :  { %685 = vmatpush.msrb.mxu0 %v278_v46  ;;  %704 = vmatpush.msrb.mxu1 %v295_v47  ;;  %v343_v46 = vld [vmem:[#allocation5 + $0x838] sm:$0xff]  ;;  %v360_v47 = vld [vmem:[#allocation5 + $0x8c0] sm:$0xff] }
  0x88   :  { %725 = vmatpush.msrb.mxu2 %v310_v48  ;;  %744 = vmatpush.msrb.mxu3 %v327_v49  ;;  %v375_v48 = vld [vmem:[#allocation5 + $0x938] sm:$0xff]  ;;  %v392_v49 = vld [vmem:[#allocation5 + $0x9c0] sm:$0xff] }
  0x89   :  { %686 = vmatpush.msrb.mxu0 %v277_v50  ;;  %705 = vmatpush.msrb.mxu1 %v294_v51  ;;  %v342_v50 = vld [vmem:[#allocation5 + $0x830] sm:$0xff]  ;;  %v359_v51 = vld [vmem:[#allocation5 + $0x8b8] sm:$0xff] }
  0x8a   :  { %726 = vmatpush.msrb.mxu2 %v309_v52  ;;  %745 = vmatpush.msrb.mxu3 %v326_v53  ;;  %v374_v52 = vld [vmem:[#allocation5 + $0x930] sm:$0xff]  ;;  %v391_v53 = vld [vmem:[#allocation5 + $0x9b8] sm:$0xff] }
  0x8b   :  { %687 = vmatpush.msrb.mxu0 %v276_v54  ;;  %706 = vmatpush.msrb.mxu1 %v293_v55  ;;  %v341_v54 = vld [vmem:[#allocation5 + $0x828] sm:$0xff]  ;;  %v358_v55 = vld [vmem:[#allocation5 + $0x8b0] sm:$0xff] }
  0x8c   :  { %727 = vmatpush.msrb.mxu2 %v308_v56  ;;  %746 = vmatpush.msrb.mxu3 %v325_v57  ;;  %v373_v56 = vld [vmem:[#allocation5 + $0x928] sm:$0xff]  ;;  %v390_v57 = vld [vmem:[#allocation5 + $0x9b0] sm:$0xff] }
  0x8d   :  { %688 = vmatpush.msrb.mxu0 %v275_v58  ;;  %707 = vmatpush.msrb.mxu1 %v292_v59  ;;  %v340_v58 = vld [vmem:[#allocation5 + $0x820] sm:$0xff]  ;;  %v357_v59 = vld [vmem:[#allocation5 + $0x8a8] sm:$0xff] }
  0x8e   :  { %728 = vmatpush.msrb.mxu2 %v307_v60  ;;  %747 = vmatpush.msrb.mxu3 %v324_v61  ;;  %v372_v60 = vld [vmem:[#allocation5 + $0x920] sm:$0xff]  ;;  %v389_v61 = vld [vmem:[#allocation5 + $0x9a8] sm:$0xff] }
  0x8f   :  { %689 = vmatpush.msrb.mxu0 %v274_v62  ;;  %708 = vmatpush.msrb.mxu1 %v291_v63  ;;  %v339_v62 = vld [vmem:[#allocation5 + $0x818] sm:$0xff]  ;;  %v356_v63 = vld [vmem:[#allocation5 + $0x8a0] sm:$0xff] }
  0x90   :  { %729 = vmatpush.msrb.mxu2 %v306_v0  ;;  %748 = vmatpush.msrb.mxu3 %v323_v1  ;;  %v371_v0 = vld [vmem:[#allocation5 + $0x918] sm:$0xff]  ;;  %v388_v1 = vld [vmem:[#allocation5 + $0x9a0] sm:$0xff] }
  0x91   :  { %690 = vmatpush.msrb.mxu0 %v273_v2  ;;  %709 = vmatpush.msrb.mxu1 %v290_v3  ;;  %v338_v2 = vld [vmem:[#allocation5 + $0x810] sm:$0xff]  ;;  %v355_v3 = vld [vmem:[#allocation5 + $0x898] sm:$0xff] }
  0x92   :  { %730 = vmatpush.msrb.mxu2 %v305_v4  ;;  %749 = vmatpush.msrb.mxu3 %v322_v5  ;;  %v370_v4 = vld [vmem:[#allocation5 + $0x910] sm:$0xff]  ;;  %v387_v5 = vld [vmem:[#allocation5 + $0x998] sm:$0xff] }
  0x93   :  { %691 = vmatpush.msrb.mxu0 %v272_v6  ;;  %710 = vmatpush.msrb.mxu1 %v289_v7  ;;  %v337_v6 = vld [vmem:[#allocation5 + $0x808] sm:$0xff]  ;;  %v354_v7 = vld [vmem:[#allocation5 + $0x890] sm:$0xff] }
  0x94   :  { %731 = vmatpush.msrb.mxu2 %v304_v8  ;;  %750 = vmatpush.msrb.mxu3 %v321_v9  ;;  %v369_v8 = vld [vmem:[#allocation5 + $0x908] sm:$0xff]  ;;  %v386_v9 = vld [vmem:[#allocation5 + $0x990] sm:$0xff] }
  0x95   :  { %692 = vmatmul.f32.vlgmr.msrb.gmra.mxu0 %v70_v10  ;;  %732 = vmatmul.f32.vlgmr.msrb.gmra.mxu2 %v72_v11  ;;  %v336_v10 = vld [vmem:[#allocation5 + $0x800] sm:$0xff]  ;;  %v353_v11 = vld [vmem:[#allocation5 + $0x888] sm:$0xff] }
  0x96   :  { %756 = vmatpush.msra.mxu0 %v351_v12  ;;  %796 = vmatpush.msra.mxu2 %v383_v13  ;;  %v368_v12 = vld [vmem:[#allocation5 + $0x900] sm:$0xff]  ;;  %v385_v13 = vld [vmem:[#allocation5 + $0x988] sm:$0xff] }
  0x97   :  { %711 = vmatpush.msrb.mxu1 %v288_v14  ;;  %751 = vmatpush.msrb.mxu3 %v320_v15  ;;  %v74_v14 = vld [vmem:[#allocation2 + $0x80] sm:$0xff]  ;;  %v76_v15 = vld [vmem:[#allocation2 + $0x90] sm:$0xff] }
  0x98   :  { %712 = vmatmul.f32.vlgmr.msrb.gmra.mxu1 %v71_v16  ;;  %752 = vmatmul.f32.vlgmr.msrb.gmra.mxu3 %v73_v17  ;;  %v415_v16 = vld [vmem:[#allocation5 + $0xa78] sm:$0xff]  ;;  %v352_v17 = vld [vmem:[#allocation5 + $0x880] sm:$0xff] }
  0x99   :  { %757 = vmatpush.msra.mxu0 %v350_v18  ;;  %776 = vmatpush.msra.mxu1 %v367_v19  ;;  %v384_v18 = vld [vmem:[#allocation5 + $0x980] sm:$0xff]  ;;  %v75_v19 = vld [vmem:[#allocation2 + $0x88] sm:$0xff] }
  0x9a   :  { %797 = vmatpush.msra.mxu2 %v382_v20  ;;  %816 = vmatpush.msra.mxu3 %v399_v21  ;;  %v77_v20 = vld [vmem:[#allocation2 + $0x98] sm:$0xff]  ;;  %v414_v21 = vld [vmem:[#allocation5 + $0xa70] sm:$0xff] }
  0x9b   :  { %758 = vmatpush.msra.mxu0 %v349_v22  ;;  %777 = vmatpush.msra.mxu1 %v366_v23  ;;  %v431_v22 = vld [vmem:[#allocation5 + $0xaf8] sm:$0xff]  ;;  %v413_v23 = vld [vmem:[#allocation5 + $0xa68] sm:$0xff] }
  0x9c   :  { %798 = vmatpush.msra.mxu2 %v381_v24  ;;  %817 = vmatpush.msra.mxu3 %v398_v25  ;;  %v430_v24 = vld [vmem:[#allocation5 + $0xaf0] sm:$0xff]  ;;  %v412_v25 = vld [vmem:[#allocation5 + $0xa60] sm:$0xff] }
  0x9d   :  { %759 = vmatpush.msra.mxu0 %v348_v26  ;;  %778 = vmatpush.msra.mxu1 %v365_v27  ;;  %v429_v26 = vld [vmem:[#allocation5 + $0xae8] sm:$0xff]  ;;  %v411_v27 = vld [vmem:[#allocation5 + $0xa58] sm:$0xff] }
  0x9e   :  { %799 = vmatpush.msra.mxu2 %v380_v28  ;;  %818 = vmatpush.msra.mxu3 %v397_v29  ;;  %v428_v28 = vld [vmem:[#allocation5 + $0xae0] sm:$0xff]  ;;  %v410_v29 = vld [vmem:[#allocation5 + $0xa50] sm:$0xff] }
  0x9f   :  { %760 = vmatpush.msra.mxu0 %v347_v30  ;;  %779 = vmatpush.msra.mxu1 %v364_v31  ;;  %v427_v30 = vld [vmem:[#allocation5 + $0xad8] sm:$0xff]  ;;  %v409_v31 = vld [vmem:[#allocation5 + $0xa48] sm:$0xff] }
  0xa0   :  { %800 = vmatpush.msra.mxu2 %v379_v32  ;;  %819 = vmatpush.msra.mxu3 %v396_v33  ;;  %v426_v32 = vld [vmem:[#allocation5 + $0xad0] sm:$0xff]  ;;  %v408_v33 = vld [vmem:[#allocation5 + $0xa40] sm:$0xff] }
  0xa1   :  { %761 = vmatpush.msra.mxu0 %v346_v34  ;;  %780 = vmatpush.msra.mxu1 %v363_v35  ;;  %v425_v34 = vld [vmem:[#allocation5 + $0xac8] sm:$0xff]  ;;  %v407_v35 = vld [vmem:[#allocation5 + $0xa38] sm:$0xff] }
  0xa2   :  { %801 = vmatpush.msra.mxu2 %v378_v36  ;;  %820 = vmatpush.msra.mxu3 %v395_v37  ;;  %v424_v36 = vld [vmem:[#allocation5 + $0xac0] sm:$0xff]  ;;  %v406_v37 = vld [vmem:[#allocation5 + $0xa30] sm:$0xff] }
  0xa3   :  { %762 = vmatpush.msra.mxu0 %v345_v38  ;;  %781 = vmatpush.msra.mxu1 %v362_v39  ;;  %v423_v38 = vld [vmem:[#allocation5 + $0xab8] sm:$0xff]  ;;  %v405_v39 = vld [vmem:[#allocation5 + $0xa28] sm:$0xff] }
  0xa4   :  { %802 = vmatpush.msra.mxu2 %v377_v40  ;;  %821 = vmatpush.msra.mxu3 %v394_v41  ;;  %v422_v40 = vld [vmem:[#allocation5 + $0xab0] sm:$0xff]  ;;  %v404_v41 = vld [vmem:[#allocation5 + $0xa20] sm:$0xff] }
  0xa5   :  { %763 = vmatpush.msra.mxu0 %v344_v42  ;;  %782 = vmatpush.msra.mxu1 %v361_v43  ;;  %v421_v42 = vld [vmem:[#allocation5 + $0xaa8] sm:$0xff]  ;;  %v403_v43 = vld [vmem:[#allocation5 + $0xa18] sm:$0xff] }
  0xa6   :  { %803 = vmatpush.msra.mxu2 %v376_v44  ;;  %822 = vmatpush.msra.mxu3 %v393_v45  ;;  %v420_v44 = vld [vmem:[#allocation5 + $0xaa0] sm:$0xff]  ;;  %v402_v45 = vld [vmem:[#allocation5 + $0xa10] sm:$0xff] }
  0xa7   :  { %764 = vmatpush.msra.mxu0 %v343_v46  ;;  %783 = vmatpush.msra.mxu1 %v360_v47  ;;  %v419_v46 = vld [vmem:[#allocation5 + $0xa98] sm:$0xff]  ;;  %v401_v47 = vld [vmem:[#allocation5 + $0xa08] sm:$0xff] }
  0xa8   :  { %804 = vmatpush.msra.mxu2 %v375_v48  ;;  %823 = vmatpush.msra.mxu3 %v392_v49  ;;  %v418_v48 = vld [vmem:[#allocation5 + $0xa90] sm:$0xff]  ;;  %v400_v49 = vld [vmem:[#allocation5 + $0xa00] sm:$0xff] }
  0xa9   :  { %765 = vmatpush.msra.mxu0 %v342_v50  ;;  %784 = vmatpush.msra.mxu1 %v359_v51  ;;  %v417_v50 = vld [vmem:[#allocation5 + $0xa88] sm:$0xff]  ;;  %v78_v51 = vld [vmem:[#allocation2 + $0xa0] sm:$0xff] }
  0xaa   :  { %805 = vmatpush.msra.mxu2 %v374_v52  ;;  %824 = vmatpush.msra.mxu3 %v391_v53  ;;  %v416_v52 = vld [vmem:[#allocation5 + $0xa80] sm:$0xff]  ;;  %v79_v53 = vld [vmem:[#allocation2 + $0xa8] sm:$0xff] }
  0xab   :  { %766 = vmatpush.msra.mxu0 %v341_v54  ;;  %785 = vmatpush.msra.mxu1 %v358_v55  ;;  %v901_v54 = vld [vmem:[#allocation7] ss:$0 sm:$0xff] }
  0xac   :  { %806 = vmatpush.msra.mxu2 %v373_v56  ;;  %825 = vmatpush.msra.mxu3 %v390_v57 }
  0xad   :  { %767 = vmatpush.msra.mxu0 %v340_v58  ;;  %786 = vmatpush.msra.mxu1 %v357_v59 }
  0xae   :  { %807 = vmatpush.msra.mxu2 %v372_v60  ;;  %826 = vmatpush.msra.mxu3 %v389_v61 }
  0xaf   :  { %768 = vmatpush.msra.mxu0 %v339_v62  ;;  %787 = vmatpush.msra.mxu1 %v356_v63 }
  0xb0   :  { %808 = vmatpush.msra.mxu2 %v371_v0  ;;  %827 = vmatpush.msra.mxu3 %v388_v1 }
  0xb1   :  { %769 = vmatpush.msra.mxu0 %v338_v2  ;;  %788 = vmatpush.msra.mxu1 %v355_v3 }
  0xb2   :  { %809 = vmatpush.msra.mxu2 %v370_v4  ;;  %828 = vmatpush.msra.mxu3 %v387_v5 }
  0xb3   :  { %770 = vmatpush.msra.mxu0 %v337_v6  ;;  %789 = vmatpush.msra.mxu1 %v354_v7 }
  0xb4   :  { %810 = vmatpush.msra.mxu2 %v369_v8  ;;  %829 = vmatpush.msra.mxu3 %v386_v9 }
  0xb5   :  { %771 = vmatpush.msra.mxu0 %v336_v10  ;;  %790 = vmatpush.msra.mxu1 %v353_v11 }
  0xb6   :  { %811 = vmatpush.msra.mxu2 %v368_v12  ;;  %830 = vmatpush.msra.mxu3 %v385_v13 }
  0xb7   :  { %772 = vmatmul.f32.vlgmr.msra.gmra.mxu0 %v74_v14  ;;  %812 = vmatmul.f32.vlgmr.msra.gmra.mxu2 %v76_v15 }
  0xb8   :  { %836 = vmatpush.msrb.mxu0 %v415_v16  ;;  %791 = vmatpush.msra.mxu1 %v352_v17 }
  0xb9   :  { %831 = vmatpush.msra.mxu3 %v384_v18  ;;  %792 = vmatmul.f32.vlgmr.msra.gmra.mxu1 %v75_v19 }
  0xba   :  { %832 = vmatmul.f32.vlgmr.msra.gmra.mxu3 %v77_v20  ;;  %837 = vmatpush.msrb.mxu0 %v414_v21 }
  0xbb   :  { %856 = vmatpush.msrb.mxu1 %v431_v22 }
  0xbc   :  { %838 = vmatpush.msrb.mxu0 %v413_v23 }
  0xbd   :  { %857 = vmatpush.msrb.mxu1 %v430_v24 }
  0xbe   :  { %839 = vmatpush.msrb.mxu0 %v412_v25 }
  0xbf   :  { %858 = vmatpush.msrb.mxu1 %v429_v26 }
  0xc0   :  { %840 = vmatpush.msrb.mxu0 %v411_v27 }
  0xc1   :  { %859 = vmatpush.msrb.mxu1 %v428_v28 }
  0xc2   :  { %841 = vmatpush.msrb.mxu0 %v410_v29 }
  0xc3   :  { %860 = vmatpush.msrb.mxu1 %v427_v30 }
  0xc4   :  { %842 = vmatpush.msrb.mxu0 %v409_v31 }
  0xc5   :  { %861 = vmatpush.msrb.mxu1 %v426_v32 }
  0xc6   :  { %843 = vmatpush.msrb.mxu0 %v408_v33 }
  0xc7   :  { %862 = vmatpush.msrb.mxu1 %v425_v34 }
  0xc8   :  { %844 = vmatpush.msrb.mxu0 %v407_v35 }
  0xc9   :  { %863 = vmatpush.msrb.mxu1 %v424_v36 }
  0xca   :  { %845 = vmatpush.msrb.mxu0 %v406_v37 }
  0xcb   :  { %864 = vmatpush.msrb.mxu1 %v423_v38 }
  0xcc   :  { %846 = vmatpush.msrb.mxu0 %v405_v39  ;;  %v453_v55 = vpop.f32.mrf.mxu0 }
  0xcd   :  { %865 = vmatpush.msrb.mxu1 %v422_v40  ;;  %v454_v56 = vadd.f32 %v901_v54, %v453_v55 }
  0xce   :  { %847 = vmatpush.msrb.mxu0 %v404_v41 }
  0xcf   :  { %866 = vmatpush.msrb.mxu1 %v421_v42  ;;  %v473_v57 = vpop.f32.mrf.mxu1 }
  0xd0   :  { %848 = vmatpush.msrb.mxu0 %v403_v43  ;;  %v474_v58 = vadd.f32 %v473_v57, %v454_v56  ;;  %v493_v59 = vpop.f32.mrf.mxu2 }
  0xd1   :  { %867 = vmatpush.msrb.mxu1 %v420_v44 }
  0xd2   :  { %849 = vmatpush.msrb.mxu0 %v402_v45  ;;  %v494_v60 = vadd.f32 %v493_v59, %v474_v58 }
  0xd3   :  { %868 = vmatpush.msrb.mxu1 %v419_v46  ;;  %v513_v61 = vpop.f32.mrf.mxu3 }
  0xd4   :  { %850 = vmatpush.msrb.mxu0 %v401_v47  ;;  %v514_v62 = vadd.f32 %v513_v61, %v494_v60 }
  0xd5   :  { %869 = vmatpush.msrb.mxu1 %v418_v48 }
  0xd6   :  { %851 = vmatpush.msrb.mxu0 %v400_v49  ;;  %v533_v63 = vpop.f32.mrf.mxu0 }
  0xd7   :  { %870 = vmatpush.msrb.mxu1 %v417_v50  ;;  %852 = vmatmul.f32.vlgmr.msrb.gmra.mxu0 %v78_v51  ;;  %v534_v0 = vadd.f32 %v533_v63, %v514_v62 }
  0xd9   :  { %871 = vmatpush.msrb.mxu1 %v416_v52  ;;  %v553_v1 = vpop.f32.mrf.mxu1 }
  0xda   :  { %872 = vmatmul.f32.vlgmr.msrb.gmra.mxu1 %v79_v53  ;;  %v554_v2 = vadd.f32 %v553_v1, %v534_v0  ;;  %v573_v3 = vpop.f32.mrf.mxu2 }
  0xdc   :  { %v574_v4 = vadd.f32 %v573_v3, %v554_v2 }
  0xdd   :  { %v593_v5 = vpop.f32.mrf.mxu3 }
  0xde   :  { %v594_v7 = vadd.f32 %v593_v5, %v574_v4 }
  0xf0   :  { %v613_v6 = vpop.f32.mrf.mxu0 }
  0xf1   :  { %v614_v8 = vadd.f32 %v613_v6, %v594_v7 }
  0xf3   :  { %v633_v9 = vpop.f32.mrf.mxu1 }
  0xf4   :  { %v634_v11 = vadd.f32 %v633_v9, %v614_v8 }
  0xf6   :  { %v653_v10 = vpop.f32.mrf.mxu2 }
  0xf7   :  { %v654_v12 = vadd.f32 %v653_v10, %v634_v11 }
  0xf9   :  { %v673_v13 = vpop.f32.mrf.mxu3 }
  0xfa   :  { %v674_v15 = vadd.f32 %v673_v13, %v654_v12 }
 0x112   :  { %v693_v14 = vpop.f32.mrf.mxu0 }
 0x113   :  { %v694_v16 = vadd.f32 %v693_v14, %v674_v15 }
 0x115   :  { %v713_v17 = vpop.f32.mrf.mxu1 }
 0x116   :  { %v714_v19 = vadd.f32 %v713_v17, %v694_v16 }
 0x118   :  { %v733_v18 = vpop.f32.mrf.mxu2 }
 0x119   :  { %v734_v20 = vadd.f32 %v733_v18, %v714_v19 }
 0x11b   :  { %v753_v21 = vpop.f32.mrf.mxu3 }
 0x11c   :  { %v754_v23 = vadd.f32 %v753_v21, %v734_v20 }
 0x134   :  { %v773_v22 = vpop.f32.mrf.mxu0 }
 0x135   :  { %v774_v24 = vadd.f32 %v773_v22, %v754_v23 }
 0x136   :  { %v793_v25 = vpop.f32.mrf.mxu1 }
 0x137   :  { %v794_v27 = vadd.f32 %v793_v25, %v774_v24 }
 0x13a   :  { %v813_v26 = vpop.f32.mrf.mxu2 }
 0x13b   :  { %v814_v28 = vadd.f32 %v813_v26, %v794_v27 }
 0x13d   :  { %v833_v29 = vpop.f32.mrf.mxu3 }
 0x13e   :  { %v834_v30 = vadd.f32 %v833_v29, %v814_v28 }
 0x154   :  { %v853_v31 = vpop.f32.mrf.mxu0 }
 0x155   :  { %v854_v32 = vadd.f32 %v853_v31, %v834_v30 }
 0x157   :  { %v873_v33 = vpop.f32.mrf.mxu1 }
 0x158   :  { %v874_v34 = vadd.f32 %v873_v33, %v854_v32 }
 0x15a   :  { %876 = vst [vmem:[#allocation8] sm:$0xff] %v874_v34 }
 0x15b   :  { %887 = dma.vmem_to_hbm [thread:$0]  %s883_s2, 128, %s885_s30, [#allocation4]  }
 0x15c   :  { %1002 = dma.done.wait [#allocation4], 128  }
 0x15d   :  { %1003 = vsyncadd [#allocation4], 4294967168 }
 0x15e   :  { %892 = vsyncpa [#allocation3], 1 }
 0x15f   :  { %893 = vsyncpa [#allocation6], 1 }
 0x160   :  { %894 = vsyncpa [#allocation4], 1 }

</bundles_post_ra>
